<compile_context>
chip_gen: v6e
topology: v6e:2x2x1
jax: 0.10.0
libtpu: 0.0.40
codegen_flags: <defaults>
</compile_context>

<pallas_src>
import functools

import jax
import jax.numpy as jnp
from jax import lax
from jax.experimental import pallas as pl
from jax.experimental.pallas import tpu as pltpu


_VMEM_LIMIT = 40 * 1024 * 1024  # > v5e 16MiB scoped default, < v7x 64MiB physical


def _round_up(x, m):
    return ((x + m - 1) // m) * m


# ----------------------------------------------------------------------------
# Kernel 1: flat matmul (1x1 convs, stem im2col, stride-2 3x3 im2col, head)
#           with fused scale/shift (+residual) (+ReLU) epilogue.
# ----------------------------------------------------------------------------
def _mm_fused_kernel(a_ref, b_ref, s_ref, t_ref, o_ref, *, relu):
    y = jnp.dot(a_ref[...], b_ref[...], preferred_element_type=jnp.float32)
    y = y * s_ref[...] + t_ref[...]
    if relu:
        y = jnp.maximum(y, 0.0)
    o_ref[...] = y.astype(o_ref.dtype)


def _mm_fused_res_kernel(a_ref, b_ref, s_ref, t_ref, r_ref, o_ref, *, relu):
    y = jnp.dot(a_ref[...], b_ref[...], preferred_element_type=jnp.float32)
    y = y * s_ref[...] + t_ref[...] + r_ref[...].astype(jnp.float32)
    if relu:
        y = jnp.maximum(y, 0.0)
    o_ref[...] = y.astype(o_ref.dtype)


def _pick_tm(M, K):
    for t in (512, 256, 128):
        if M >= t:
            tm = t
            break
    else:
        tm = _round_up(max(M, 1), 8)
    # keep the (tm, K) bf16 activation block <= ~4 MiB
    while tm > 128 and tm * K * 2 > 4 * 1024 * 1024:
        tm //= 2
    return tm


def _pick_tn(N):
    if N < 128:
        return N                      # block equals full array dim -> legal
    return min(512, (N // 128) * 128)


def matmul_fused(a, b, scale, shift, *, relu, residual=None,
                 out_dtype=jnp.bfloat16):
    """(M, K) @ (K, N) with fused y = acc*scale + shift (+res) (+ReLU).

    `b`/`scale`/`shift` are pre-prepared ((K, N) bf16, (1, N) f32).  No M/N
    padding of the activation: ragged trailing blocks are masked by Pallas on
    the output store.  K is exact (tk == K => single k step, no k loop).
    """
    M, K = a.shape
    Kb, N = b.shape
    assert K == Kb

    a = a.astype(jnp.bfloat16)
    tm = _pick_tm(M, K)
    tn = _pick_tn(N)
    # v7x has 2 TensorCores: try to expose >= 2 parallel grid blocks.
    if pl.cdiv(M, tm) * pl.cdiv(N, tn) < 2:
        if tn % 256 == 0:
            tn //= 2
        elif tm >= 256:
            tm //= 2
    grid = (pl.cdiv(M, tm), pl.cdiv(N, tn))

    a_spec = pl.BlockSpec((tm, K), lambda i, j: (i, 0))
    b_spec = pl.BlockSpec((K, tn), lambda i, j: (0, j))
    v_spec = pl.BlockSpec((1, tn), lambda i, j: (0, j))
    o_spec = pl.BlockSpec((tm, tn), lambda i, j: (i, j))

    if residual is None:
        kern = functools.partial(_mm_fused_kernel, relu=relu)
        in_specs = [a_spec, b_spec, v_spec, v_spec]
        args = (a, b, scale, shift)
    else:
        kern = functools.partial(_mm_fused_res_kernel, relu=relu)
        in_specs = [a_spec, b_spec, v_spec, v_spec, o_spec]
        args = (a, b, scale, shift, residual.astype(jnp.bfloat16))

    return pl.pallas_call(
        kern,
        out_shape=jax.ShapeDtypeStruct((M, N), out_dtype),
        grid=grid,
        in_specs=in_specs,
        out_specs=o_spec,
        compiler_params=pltpu.CompilerParams(
            dimension_semantics=("parallel", "parallel"),
            vmem_limit_bytes=_VMEM_LIMIT),
    )(*args)


# ----------------------------------------------------------------------------
# Kernel 2: direct (no-im2col) 3x3 stride-1 conv, padding == dilation.
#           9 taps statically unrolled as shifted windows of the padded
#           activation; cin chunked over the reduction grid axis if > 512.
# ----------------------------------------------------------------------------
def _conv3x3_kernel(a_ref, w_ref, s_ref, t_ref, o_ref, acc_ref, *,
                    H, W, dil, relu):
    c = pl.program_id(2)

    @pl.when(c == 0)
    def _():
        acc_ref[...] = jnp.zeros_like(acc_ref)

    acc = acc_ref[...]
    for ti in range(3):
        for tj in range(3):
            a = a_ref[0, ti * dil:ti * dil + H, tj * dil:tj * dil + W, :]
            a2 = a.reshape(H * W, a.shape[-1])
            acc = acc + jnp.dot(a2, w_ref[ti * 3 + tj],
                                preferred_element_type=jnp.float32)
    acc_ref[...] = acc

    @pl.when(c == pl.num_programs(2) - 1)
    def _():
        y = acc * s_ref[...] + t_ref[...]
        if relu:
            y = jnp.maximum(y, 0.0)
        o_ref[...] = y.reshape(o_ref.shape).astype(o_ref.dtype)


def conv3x3_direct(x, w9, scale, shift, *, dilation, relu,
                   out_dtype=jnp.bfloat16):
    """x: (B,H,W,C) bf16; w9: (9,C,N) bf16; scale/shift: (1,N) f32."""
    B, H, W, C = x.shape
    _, _, N = w9.shape
    d = dilation
    xp = jnp.pad(x.astype(jnp.bfloat16), ((0, 0), (d, d), (d, d), (0, 0)))
    Hp, Wp = H + 2 * d, W + 2 * d

    tc = C if C <= 512 else 512
    assert C % tc == 0
    cc = C // tc

    tn = N if N <= 512 else 512
    # v7x: expose >= 2 parallel blocks (batch x output-channel blocks).
    if B * pl.cdiv(N, tn) < 2 and tn % 256 == 0:
        tn //= 2
    nb = pl.cdiv(N, tn)

    kern = functools.partial(_conv3x3_kernel, H=H, W=W, dil=d, relu=relu)

    return pl.pallas_call(
        kern,
        out_shape=jax.ShapeDtypeStruct((B, H, W, N), out_dtype),
        grid=(B, nb, cc),
        in_specs=[
            pl.BlockSpec((1, Hp, Wp, tc), lambda b, n, c: (b, 0, 0, c)),
            pl.BlockSpec((9, tc, tn), lambda b, n, c: (0, c, n)),
            pl.BlockSpec((1, tn), lambda b, n, c: (0, n)),
            pl.BlockSpec((1, tn), lambda b, n, c: (0, n)),
        ],
        out_specs=pl.BlockSpec((1, H, W, tn), lambda b, n, c: (b, 0, 0, n)),
        scratch_shapes=[pltpu.VMEM((H * W, tn), jnp.float32)],
        compiler_params=pltpu.CompilerParams(
            dimension_semantics=("parallel", "parallel", "arbitrary"),
            vmem_limit_bytes=_VMEM_LIMIT),
    )(xp, w9, scale, shift)


# ----------------------------------------------------------------------------
# im2col glue (only for the 7x7 stride-2 stem and the single 3x3 stride-2 conv)
# ----------------------------------------------------------------------------
def _im2col(x, kh, kw, stride, padding, dilation):
    B, H, W, C = x.shape
    xp = jnp.pad(x, ((0, 0), (padding, padding), (padding, padding), (0, 0)))
    Ho = (H + 2 * padding - dilation * (kh - 1) - 1) // stride + 1
    Wo = (W + 2 * padding - dilation * (kw - 1) - 1) // stride + 1
    cols = []
    for i in range(kh):
        for j in range(kw):
            r0, c0 = i * dilation, j * dilation
            sl = xp[:, r0:r0 + (Ho - 1) * stride + 1:stride,
                       c0:c0 + (Wo - 1) * stride + 1:stride, :]
            cols.append(sl)
    patches = jnp.concatenate(cols, axis=-1)
    return patches.reshape(B * Ho * Wo, kh * kw * C), (B, Ho, Wo)


def maxpool3x3s2p1(x):
    # glue: equivalent to nn.MaxPool2d(3, 2, 1)
    return lax.reduce_window(x, jnp.array(-jnp.inf, dtype=x.dtype), lax.max,
                             window_dimensions=(1, 3, 3, 1),
                             window_strides=(1, 2, 2, 1),
                             padding=((0, 0), (1, 1), (1, 1), (0, 0)))


# ----------------------------------------------------------------------------
# Deterministic parameter construction (synthetic, shapes match fcn_resnet50)
# ----------------------------------------------------------------------------
class ParamGen:
    def __init__(self, seed=0):
        self.key = jax.random.PRNGKey(seed)

    def next(self):
        self.key, k = jax.random.split(self.key)
        return k


def make_conv(pg, kh, kw, cin, cout, stride=1, padding=0, dilation=1, bias=False):
    std = (2.0 / (kh * kw * cin)) ** 0.5
    w = jax.random.normal(pg.next(), (kh, kw, cin, cout), jnp.float32) * std
    b = (jax.random.normal(pg.next(), (cout,), jnp.float32) * 0.01) if bias else None
    return dict(w=w, b=b, stride=stride, padding=padding, dilation=dilation)


def make_bn(pg, c, eps=1e-5):
    gamma = 1.0 + 0.05 * jax.random.normal(pg.next(), (c,), jnp.float32)
    beta = 0.05 * jax.random.normal(pg.next(), (c,), jnp.float32)
    mean = 0.05 * jax.random.normal(pg.next(), (c,), jnp.float32)
    var = 1.0 + 0.05 * jax.random.uniform(pg.next(), (c,), jnp.float32)
    scale = gamma / jnp.sqrt(var + eps)
    shift = beta - mean * scale
    return dict(scale=scale.reshape(1, c), shift=shift.reshape(1, c))


def make_bottleneck(pg, inplanes, planes, stride, dilation, downsample):
    width = planes
    p = dict(
        conv1=make_conv(pg, 1, 1, inplanes, width),
        bn1=make_bn(pg, width),
        conv2=make_conv(pg, 3, 3, width, width, stride=stride,
                        padding=dilation, dilation=dilation),
        bn2=make_bn(pg, width),
        conv3=make_conv(pg, 1, 1, width, planes * 4),
        bn3=make_bn(pg, planes * 4),
    )
    if downsample:
        p['down_conv'] = make_conv(pg, 1, 1, inplanes, planes * 4, stride=stride)
        p['down_bn'] = make_bn(pg, planes * 4)
    return p


def make_layer(pg, inplanes, planes, blocks, stride, dilate, cur_dilation):
    prev_dilation = cur_dilation
    if dilate:
        cur_dilation *= stride
        stride = 1
    needs_down = (stride != 1) or (inplanes != planes * 4)
    layer = [make_bottleneck(pg, inplanes, planes, stride, prev_dilation, needs_down)]
    inplanes = planes * 4
    for _ in range(1, blocks):
        layer.append(make_bottleneck(pg, inplanes, planes, 1, cur_dilation, False))
    return layer, inplanes, cur_dilation


def make_fcn_resnet50_p2p_params(seed=0):
    pg = ParamGen(seed)
    params = {}
    # stem
    params['conv1'] = make_conv(pg, 7, 7, 3, 64, stride=2, padding=3)
    params['bn1'] = make_bn(pg, 64)
    # resnet50 body, replace_stride_with_dilation = [False, True, True]
    inplanes, dil = 64, 1
    params['layer1'], inplanes, dil = make_layer(pg, inplanes, 64, 3, 1, False, dil)
    params['layer2'], inplanes, dil = make_layer(pg, inplanes, 128, 4, 2, False, dil)
    params['layer3'], inplanes, dil = make_layer(pg, inplanes, 256, 6, 2, True, dil)
    params['layer4'], inplanes, dil = make_layer(pg, inplanes, 512, 3, 2, True, dil)
    # FCNHead(2048, 21)
    params['head_conv1'] = make_conv(pg, 3, 3, 2048, 512, padding=1)
    params['head_bn'] = make_bn(pg, 512)
    params['head_conv2'] = make_conv(pg, 1, 1, 512, 21, bias=True)
    # extra p2p classifier: Conv2d(21, 1, kernel_size=1)
    params['classifier'] = make_conv(pg, 1, 1, 21, 1, bias=True)
    return params


# ----------------------------------------------------------------------------
# One-time parameter preparation (bf16 cast, layout, BN fold, head folding)
# ----------------------------------------------------------------------------
def prepare_conv_bn(conv, bn):
    kh, kw, cin, cout = conv['w'].shape
    if bn is not None:
        scale = bn['scale'].astype(jnp.float32)
        shift = bn['shift'].astype(jnp.float32)
    else:
        scale = jnp.ones((1, cout), jnp.float32)
        shift = (conv['b'].reshape(1, cout).astype(jnp.float32)
                 if conv['b'] is not None else jnp.zeros((1, cout), jnp.float32))
    wb = conv['w'].astype(jnp.bfloat16)
    p = dict(kh=kh, kw=kw, cin=cin, cout=cout, stride=conv['stride'],
             padding=conv['padding'], dilation=conv['dilation'],
             scale=scale, shift=shift)
    tc = cin if cin <= 512 else 512
    if (kh == 3 and kw == 3 and conv['stride'] == 1
            and conv['padding'] == conv['dilation'] and cin % tc == 0):
        p['mode'] = 'direct3x3'
        p['w9'] = wb.reshape(9, cin, cout)
    else:
        p['mode'] = 'im2col'
        p['w2d'] = wb.reshape(kh * kw * cin, cout)
    return p


def prepare_bottleneck(p):
    q = dict(conv1=prepare_conv_bn(p['conv1'], p['bn1']),
             conv2=prepare_conv_bn(p['conv2'], p['bn2']),
             conv3=prepare_conv_bn(p['conv3'], p['bn3']))
    if 'down_conv' in p:
        q['down'] = prepare_conv_bn(p['down_conv'], p['down_bn'])
    return q


def prepare_params(params):
    prep = dict(conv1=prepare_conv_bn(params['conv1'], params['bn1']))
    for name in ('layer1', 'layer2', 'layer3', 'layer4'):
        prep[name] = [prepare_bottleneck(b) for b in params[name]]
    prep['head_conv1'] = prepare_conv_bn(params['head_conv1'], params['head_bn'])

    # Fold head_conv2 (512->21, bias) + p2p classifier (21->1, bias) into one
    # 512->1 1x1 conv applied BEFORE the bilinear upsample (exact: bilinear
    # interpolation is linear, channel-pointwise and its weights sum to 1).
    # The single output channel is padded to 128 lanes ONCE, here.
    w_head = params['head_conv2']['w'].reshape(512, 21)
    b_head = params['head_conv2']['b']
    w_cls = params['classifier']['w'].reshape(21, 1)
    b_cls = params['classifier']['b']
    w_comb = w_head @ w_cls                        # (512, 1)
    b_comb = (b_head @ w_cls + b_cls)[0]           # scalar
    wp = jnp.zeros((512, 128), jnp.float32).at[:, 0].set(w_comb[:, 0])
    prep['final_w'] = wp.astype(jnp.bfloat16)
    prep['final_scale'] = jnp.ones((1, 128), jnp.float32)
    prep['final_shift'] = jnp.zeros((1, 128), jnp.float32).at[0, 0].set(b_comb)
    return prep


# ----------------------------------------------------------------------------
# Forward pass
# ----------------------------------------------------------------------------
def conv_apply(x, pc, *, relu, residual=None):
    cout = pc['cout']
    if pc['mode'] == 'direct3x3' and residual is None:
        try:
            return conv3x3_direct(x, pc['w9'], pc['scale'], pc['shift'],
                                  dilation=pc['dilation'], relu=relu)
        except Exception:
            # TODO(synk): fallback if the direct 3x3 kernel fails to lower on
            # some platform -- uses the (slower) im2col matmul path below.
            pass
    if pc['kh'] == 1 and pc['kw'] == 1 and pc['padding'] == 0:
        s = pc['stride']
        xs = x if s == 1 else x[:, ::s, ::s, :]
        B, Ho, Wo, _ = xs.shape
        patches = xs.reshape(B * Ho * Wo, pc['cin'])
    else:
        patches, (B, Ho, Wo) = _im2col(x.astype(jnp.bfloat16), pc['kh'], pc['kw'],
                                       pc['stride'], pc['padding'], pc['dilation'])
    w2d = pc['w2d'] if 'w2d' in pc else pc['w9'].reshape(-1, cout)
    r = None if residual is None else residual.reshape(-1, cout)
    y = matmul_fused(patches, w2d, pc['scale'], pc['shift'],
                     relu=relu, residual=r)
    return y.reshape(B, Ho, Wo, cout)


def bottleneck_fwd(x, p):
    out = conv_apply(x, p['conv1'], relu=True)
    out = conv_apply(out, p['conv2'], relu=True)
    identity = conv_apply(x, p['down'], relu=False) if 'down' in p else x
    # conv3 + BN + residual add + ReLU fused into one matmul epilogue
    return conv_apply(out, p['conv3'], relu=True, residual=identity)


def fcn_resnet50_p2p_forward(prep, x_nchw):
    # NCHW -> NHWC; activations kept in bf16 (intentional precision choice).
    x = jnp.transpose(x_nchw, (0, 2, 3, 1)).astype(jnp.bfloat16)
    B, H, W, _ = x.shape

    x = conv_apply(x, prep['conv1'], relu=True)
    x = maxpool3x3s2p1(x)
    for name in ('layer1', 'layer2', 'layer3', 'layer4'):
        for blk in prep[name]:
            x = bottleneck_fwd(x, blk)

    # FCN head: 3x3 conv + BN + ReLU (direct 3x3 kernel, cin chunked)
    x = conv_apply(x, prep['head_conv1'], relu=True)
    # TODO(synk): Dropout(0.1) of the FCN head is an eval-mode identity here.

    # Folded head_conv2 + p2p classifier: one 512->1 (lane-padded to 128)
    # 1x1 conv before the bilinear upsample.
    Bh, Ho, Wo, C = x.shape
    y = matmul_fused(x.reshape(Bh * Ho * Wo, C), prep['final_w'],
                     prep['final_scale'], prep['final_shift'],
                     relu=False, out_dtype=jnp.float32)
    y = y[:, :1].reshape(Bh, Ho, Wo, 1)

    # F.interpolate(..., mode='bilinear', align_corners=False) — 1 channel
    y = jax.image.resize(y, (B, H, W, 1), method='bilinear')
    return jnp.transpose(y, (0, 3, 1, 2))  # NHWC -> NCHW, (B, 1, H, W)


# ----------------------------------------------------------------------------
if __name__ == "__main__":
    params = make_fcn_resnet50_p2p_params(seed=0)
    prep = prepare_params(params)

    key = jax.random.PRNGKey(0)
    x = jax.random.normal(key, (2, 3, 64, 64), jnp.float32)  # small NCHW input

    out = fcn_resnet50_p2p_forward(prep, x)
    out = jax.block_until_ready(out)
    assert out.shape == (2, 1, 64, 64), out.shape
    assert bool(jnp.all(jnp.isfinite(out)))
    print("KERNEL_OK")
</pallas_src>

<mosaic_0001>
module attributes {stable_mosaic.version = 11 : i64} {
  func.func @_mm_fused_kernel(%arg0: i32, %arg1: i32, %arg2: memref<512x147xbf16, #tpu.memory_space<vmem>>, %arg3: memref<147x64xbf16, #tpu.memory_space<vmem>>, %arg4: memref<1x64xf32, #tpu.memory_space<vmem>>, %arg5: memref<1x64xf32, #tpu.memory_space<vmem>>, %arg6: memref<512x64xbf16, #tpu.memory_space<vmem>>) attributes {dimension_semantics = [#tpu.dimension_semantics<parallel>, #tpu.dimension_semantics<parallel>], iteration_bounds = array<i64: 4, 1>, scalar_prefetch = 0 : i64, scratch_operands = 0 : i64, tpu.core_type = #tpu.core_type<tc>, window_params = [{transform_indices = @transform_0, window_bounds = array<i64: 512, 147>}, {transform_indices = @transform_1, window_bounds = array<i64: 147, 64>}, {transform_indices = @transform_2, window_bounds = array<i64: 1, 64>}, {transform_indices = @transform_3, window_bounds = array<i64: 1, 64>}, {transform_indices = @transform_4, window_bounds = array<i64: 512, 64>}]} {
    %c0 = arith.constant 0 : index
    %c0_0 = arith.constant 0 : index
    %0 = vector.load %arg2[%c0, %c0_0] : memref<512x147xbf16, #tpu.memory_space<vmem>>, vector<512x147xbf16>
    %c0_1 = arith.constant 0 : index
    %c0_2 = arith.constant 0 : index
    %1 = vector.load %arg3[%c0_1, %c0_2] : memref<147x64xbf16, #tpu.memory_space<vmem>>, vector<147x64xbf16>
    %cst = arith.constant dense<0.000000e+00> : vector<512x64xf32>
    %2 = tpu.matmul %0, %1, %cst {dimension_numbers = #tpu.dot_dimension_numbers<[1], [0], [0], [1], [0, 0, 1, 1], [], []>} : vector<512x147xbf16>, vector<147x64xbf16>, vector<512x64xf32> -> vector<512x64xf32>
    %c0_3 = arith.constant 0 : index
    %c0_4 = arith.constant 0 : index
    %3 = vector.load %arg4[%c0_3, %c0_4] : memref<1x64xf32, #tpu.memory_space<vmem>>, vector<1x64xf32>
    %4 = vector.broadcast %3 : vector<1x64xf32> to vector<512x64xf32>
    %5 = arith.mulf %2, %4 : vector<512x64xf32>
    %c0_5 = arith.constant 0 : index
    %c0_6 = arith.constant 0 : index
    %6 = vector.load %arg5[%c0_5, %c0_6] : memref<1x64xf32, #tpu.memory_space<vmem>>, vector<1x64xf32>
    %7 = vector.broadcast %6 : vector<1x64xf32> to vector<512x64xf32>
    %8 = arith.addf %5, %7 : vector<512x64xf32>
    %cst_7 = arith.constant 0.000000e+00 : f32
    %9 = vector.broadcast %cst_7 : f32 to vector<512x64xf32>
    %10 = arith.maximumf %8, %9 : vector<512x64xf32>
    %11 = arith.truncf %10 : vector<512x64xf32> to vector<512x64xbf16>
    %c0_8 = arith.constant 0 : index
    %c0_9 = arith.constant 0 : index
    %12 = vector.load %arg6[%c0_8, %c0_9] : memref<512x64xbf16, #tpu.memory_space<vmem>>, vector<512x64xbf16>
    tpu.vector_store %arg6[%c0_8, %c0_9], %11 {strides = array<i32>} : memref<512x64xbf16, #tpu.memory_space<vmem>>, vector<512x64xbf16>,
    return
  }
  func.func @transform_0(%arg0: i32, %arg1: i32) -> (i32, i32) {
    %c0_i32 = arith.constant 0 : i32
    %c0_i32_0 = arith.constant 0 : i32
    return %arg0, %c0_i32 : i32, i32
  }
  func.func @transform_1(%arg0: i32, %arg1: i32) -> (i32, i32) {
    %c0_i32 = arith.constant 0 : i32
    %c0_i32_0 = arith.constant 0 : i32
    return %c0_i32, %arg1 : i32, i32
  }
  func.func @transform_2(%arg0: i32, %arg1: i32) -> (i32, i32) {
    %c0_i32 = arith.constant 0 : i32
    %c0_i32_0 = arith.constant 0 : i32
    return %c0_i32, %arg1 : i32, i32
  }
  func.func @transform_3(%arg0: i32, %arg1: i32) -> (i32, i32) {
    %c0_i32 = arith.constant 0 : i32
    %c0_i32_0 = arith.constant 0 : i32
    return %c0_i32, %arg1 : i32, i32
  }
  func.func @transform_4(%arg0: i32, %arg1: i32) -> (i32, i32) {
    %c0_i32 = arith.constant 0 : i32
    return %arg0, %arg1 : i32, i32
  }
}

</mosaic_0001>

<bundles_post_ra>
// kernel: tpu_custom_call.1
= control target key start
LH: loop header
LB: loop body
LE: loop exit
PB: predicated region body
PF: predicated region fallthrough
CT: control target
= control target key end

     0   :  { %s2187_s15 = smov 0   ;;  %s2189_s16 = smov 0   ;;  %s2620_s0 = inlined_call_operand.vmem [shape: bf16[2048,147], index: 0, kind: input, shape index: {}]   ;;  %s2621_s1 = inlined_call_operand.vmem [shape: bf16[147,64], index: 1, kind: input, shape index: {}]   ;;  %s2622_s2 = inlined_call_operand.vmem [shape: f32[1,64], index: 2, kind: input, shape index: {}]   ;;  %s2623_s3 = inlined_call_operand.vmem [shape: f32[1,64], index: 3, kind: input, shape index: {}]   ;;  %s2624_s4 = inlined_call_operand.vmem [shape: bf16[2048,64], index: 4, kind: output, shape index: {}]  }
   0x1   :  { %s2191_s17 = smov 0  }
   0x2 LB: > { %s26_s18 = sadd.s32 1, %s2154_s16  ;;  %p1739_p0 = scmp.ge.s32.totalorder %s2158_s17, 1  ;;  %s2158_s17 = sphi %s2191_s17, %s14_s17   ;;  %s2154_s16 = sphi %s2189_s16, %s2626_s16   ;;  %s2150_s15 = sphi %s2187_s15, %s2625_s15  }
   0x3   : > { %p28_p1 = scmp.ge.s32.totalorder %s26_s18, 4  ;;  %p203_p2 = scmp.lt.s32.totalorder %s2158_s17, 5 }
   0x5   : > { %s2628_s18 = smov (%p28_p1, %s26_s18), 0  ;;  %p204_p3 = pnand %p1739_p0, %p203_p2 }
   0x6   : > { %s1740_s25 = sshll.u32 (!%p204_p3), %s2150_s15, 6 }
   0x7   : > { %207 = sbr.rel (%p204_p3) target bundleno = 379 (0x17b), region = 36  ;;  %p244_p4 = scmp.lt.s32.totalorder (!%p204_p3), %s1740_s25, 255 }
   0xc   : > { %v2030_v0 = vld [vmem:[%s2621_s1 + $0x38] sm:$0xff]   ;;  %v2160_v1 = vmov 0   ;;  %v2031_v2 = vld [vmem:[%s2621_s1 + $0x30] sm:$0xff]   ;;  %v2032_v3 = vld [vmem:[%s2621_s1 + $0x28] sm:$0xff]   ;;  %s2630_s25 = smov (!%p244_p4, %s1740_s25), 255  ;;  %vm698_vm0 = vcmask 154624  }
   0xd   : > { %802 = vmatprep.subr.bf16.mxu0 %v2160_v1  ;;  %1984 = vmatprep.subr.bf16.mxu1 %v2160_v1  ;;  %v2033_v4 = vld [vmem:[%s2621_s1 + $0x20] sm:$0xff]   ;;  %s1919_s28 = sshll.u32 %s2630_s25, 3  ;;  %v2034_v5 = vld [vmem:[%s2621_s1 + $0x18] sm:$0xff]   ;;  %v2035_v8 = vld [vmem:[%s2621_s1 + $0x10] sm:$0xff]   ;;  %vm795_vm1 = vcmask 1040384   ;;  %vm796_vm2 = vcmask 1041408  }
   0xe   : > { %803 = vmatpush1.bf16.msra.mxu0 %v2030_v0  ;;  %1994 = vmatpush1.bf16.msra.mxu1 %v2030_v0  ;;  %s2223_s5 = scalar_lea.vmem %s2620_s0, %s1919_s28  ;;  %v2036_v9 = vld [vmem:[%s2621_s1 + $0x8] sm:$0xff]   ;;  %v2161_v10 = vmov 65535   ;;  %v2037_v12 = vld [vmem:[%s2621_s1] sm:$0xff]   ;;  %s1744_s26 = sshll.u32 %s2630_s25, 2  ;;  %vm1553_vm3 = vcmask 519168  }
   0xf   : > { %804 = vmatprep.subr.bf16.mxu0 %v2160_v1  ;;  %1985 = vmatprep.subr.bf16.mxu1 %v2160_v1  ;;  %v2042_v6 = vld [vmem:[%s2223_s5 + $0x4] ss:$8 sps:$4 sm:$0xff]   ;;  %v797_v11 = vsel %vm795_vm1, 4294967295, %v2161_v10  ;;  %v2038_v13 = vld [vmem:[%s2621_s1 + $0x48] ss:$0 sps:$4 sm:$0x33]   ;;  %s2359_s29 = scalar_lea.vmem %s2624_s4, %s1744_s26 }
  0x10   : > { %v2045_v7 = vld [vmem:[%s2223_s5 + $0x104] ss:$8 sps:$4 sm:$0xff]   ;;  %1819 = vmatprep.mubr.msk.bf16.mxu0 %vm698_vm0, %v2042_v6  ;;  %v798_v14 = vsel %vm796_vm2, %v797_v11, 0  ;;  %v2040_v17 = vld [vmem:[%s2223_s5] ss:$8 sps:$4 sm:$0xff]  }
  0x11   : > { %1835 = vmatprep.mubr.msk.bf16.mxu1 %vm698_vm0, %v2045_v7  ;;  %v800_v15 = vand.u32 %v2038_v13, %v798_v14  ;;  %v2039_v16 = vld [vmem:[%s2621_s1 + $0x40] sm:$0xff]   ;;  %v2046_v19 = vld [vmem:[%s2223_s5 + $0x14] ss:$8 sps:$4 sm:$0xff]   ;;  %v2050_v21 = vld [vmem:[%s2223_s5 + $0x10] ss:$8 sps:$4 sm:$0xff]  }
  0x12   : > { %805 = vmatpush1.bf16.msra.mxu0 %v2031_v2  ;;  %1995 = vmatpush1.bf16.msra.mxu1 %v2031_v2  ;;  %v2043_v18 = vld [vmem:[%s2223_s5 + $0x100] ss:$8 sps:$4 sm:$0xff]   ;;  %v2048_v20 = vld [vmem:[%s2223_s5 + $0x114] ss:$8 sps:$4 sm:$0xff]   ;;  %v2051_v22 = vld [vmem:[%s2223_s5 + $0x110] ss:$8 sps:$4 sm:$0xff]  }
  0x13   : > { %806 = vmatprep.subr.bf16.mxu0 %v2160_v1  ;;  %1986 = vmatprep.subr.bf16.mxu1 %v2160_v1  ;;  %v2052_v23 = vld [vmem:[%s2223_s5 + $0x24] ss:$8 sps:$4 sm:$0xff]   ;;  %v2056_v25 = vld [vmem:[%s2223_s5 + $0x20] ss:$8 sps:$4 sm:$0xff]   ;;  %v2058_v27 = vld [vmem:[%s2223_s5 + $0x34] ss:$8 sps:$4 sm:$0xff]  }
  0x14   : > { %v2054_v24 = vld [vmem:[%s2223_s5 + $0x124] ss:$8 sps:$4 sm:$0xff]   ;;  %v2057_v26 = vld [vmem:[%s2223_s5 + $0x120] ss:$8 sps:$4 sm:$0xff]   ;;  %v2060_v28 = vld [vmem:[%s2223_s5 + $0x134] ss:$8 sps:$4 sm:$0xff]  }
  0x15   : > { %v2062_v29 = vld [vmem:[%s2223_s5 + $0x30] ss:$8 sps:$4 sm:$0xff]   ;;  %v2064_v31 = vld [vmem:[%s2223_s5 + $0x44] ss:$8 sps:$4 sm:$0xff]   ;;  %v2068_v33 = vld [vmem:[%s2223_s5 + $0x40] ss:$8 sps:$4 sm:$0xff]  }
  0x16   : > { %807 = vmatpush1.bf16.msra.mxu0 %v2032_v3  ;;  %1996 = vmatpush1.bf16.msra.mxu1 %v2032_v3  ;;  %v2063_v30 = vld [vmem:[%s2223_s5 + $0x130] ss:$8 sps:$4 sm:$0xff]   ;;  %v2066_v32 = vld [vmem:[%s2223_s5 + $0x144] ss:$8 sps:$4 sm:$0xff]   ;;  %v2069_v34 = vld [vmem:[%s2223_s5 + $0x140] ss:$8 sps:$4 sm:$0xff]  }
  0x17   : > { %808 = vmatprep.subr.bf16.mxu0 %v2160_v1  ;;  %1987 = vmatprep.subr.bf16.mxu1 %v2160_v1  ;;  %v2070_v35 = vld [vmem:[%s2223_s5 + $0x54] ss:$8 sps:$4 sm:$0xff]   ;;  %v2074_v37 = vld [vmem:[%s2223_s5 + $0x50] ss:$8 sps:$4 sm:$0xff]   ;;  %v2076_v39 = vld [vmem:[%s2223_s5 + $0x64] ss:$8 sps:$4 sm:$0xff]  }
  0x18   : > { %v2072_v36 = vld [vmem:[%s2223_s5 + $0x154] ss:$8 sps:$4 sm:$0xff]   ;;  %v2075_v38 = vld [vmem:[%s2223_s5 + $0x150] ss:$8 sps:$4 sm:$0xff]   ;;  %v2078_v40 = vld [vmem:[%s2223_s5 + $0x164] ss:$8 sps:$4 sm:$0xff]  }
  0x19   : > { %v2080_v41 = vld [vmem:[%s2223_s5 + $0x60] ss:$8 sps:$4 sm:$0xff]   ;;  %v2082_v43 = vld [vmem:[%s2223_s5 + $0x74] ss:$8 sps:$4 sm:$0xff]   ;;  %v2086_v45 = vld [vmem:[%s2223_s5 + $0x70] ss:$8 sps:$4 sm:$0xff]  }
  0x1a   : > { %809 = vmatpush1.bf16.msra.mxu0 %v2033_v4  ;;  %1997 = vmatpush1.bf16.msra.mxu1 %v2033_v4  ;;  %v2081_v42 = vld [vmem:[%s2223_s5 + $0x160] ss:$8 sps:$4 sm:$0xff]   ;;  %v2084_v44 = vld [vmem:[%s2223_s5 + $0x174] ss:$8 sps:$4 sm:$0xff]   ;;  %v2087_v46 = vld [vmem:[%s2223_s5 + $0x170] ss:$8 sps:$4 sm:$0xff]  }
  0x1b   : > { %810 = vmatprep.subr.bf16.mxu0 %v2160_v1  ;;  %1988 = vmatprep.subr.bf16.mxu1 %v2160_v1  ;;  %v2088_v47 = vld [vmem:[%s2223_s5 + $0x84] ss:$8 sps:$4 sm:$0xff]   ;;  %v2092_v49 = vld [vmem:[%s2223_s5 + $0x80] ss:$8 sps:$4 sm:$0xff]   ;;  %v2094_v51 = vld [vmem:[%s2223_s5 + $0x94] ss:$8 sps:$4 sm:$0xff]  }
  0x1c   : > { %v2090_v48 = vld [vmem:[%s2223_s5 + $0x184] ss:$8 sps:$4 sm:$0xff]   ;;  %v2093_v50 = vld [vmem:[%s2223_s5 + $0x180] ss:$8 sps:$4 sm:$0xff]   ;;  %v2096_v52 = vld [vmem:[%s2223_s5 + $0x194] ss:$8 sps:$4 sm:$0xff]  }
  0x1d   : > { %v2098_v53 = vld [vmem:[%s2223_s5 + $0x90] ss:$8 sps:$4 sm:$0xff]   ;;  %v2100_v55 = vld [vmem:[%s2223_s5 + $0xa4] ss:$8 sps:$4 sm:$0xff]   ;;  %v2104_v57 = vld [vmem:[%s2223_s5 + $0xa0] ss:$8 sps:$4 sm:$0xff]  }
  0x1e   : > { %811 = vmatpush1.bf16.msra.mxu0 %v2034_v5  ;;  %1998 = vmatpush1.bf16.msra.mxu1 %v2034_v5  ;;  %v2099_v54 = vld [vmem:[%s2223_s5 + $0x190] ss:$8 sps:$4 sm:$0xff]   ;;  %v2102_v56 = vld [vmem:[%s2223_s5 + $0x1a4] ss:$8 sps:$4 sm:$0xff]   ;;  %v2105_v58 = vld [vmem:[%s2223_s5 + $0x1a0] ss:$8 sps:$4 sm:$0xff]  }
  0x1f   : > { %812 = vmatprep.subr.bf16.mxu0 %v2160_v1  ;;  %1989 = vmatprep.subr.bf16.mxu1 %v2160_v1  ;;  %v2106_v59 = vld [vmem:[%s2223_s5 + $0xb4] ss:$8 sps:$4 sm:$0xff]   ;;  %v2110_v61 = vld [vmem:[%s2223_s5 + $0xb0] ss:$8 sps:$4 sm:$0xff]   ;;  %v2112_v63 = vld [vmem:[%s2223_s5 + $0xc4] ss:$8 sps:$4 sm:$0xff]  }
  0x20   : > { %v2108_v60 = vld [vmem:[%s2223_s5 + $0x1b4] ss:$8 sps:$4 sm:$0xff]   ;;  %v2111_v62 = vld [vmem:[%s2223_s5 + $0x1b0] ss:$8 sps:$4 sm:$0xff]   ;;  %v2114_v0 = vld [vmem:[%s2223_s5 + $0x1c4] ss:$8 sps:$4 sm:$0xff]  }
  0x21   : > { %v2117_v2 = vld [vmem:[%s2223_s5 + $0x1c0] ss:$8 sps:$4 sm:$0xff]   ;;  %v2118_v3 = vld [vmem:[%s2223_s5 + $0xd4] ss:$8 sps:$4 sm:$0xff]   ;;  %v2122_v5 = vld [vmem:[%s2223_s5 + $0xd0] ss:$8 sps:$4 sm:$0xff]  }
  0x22   : > { %813 = vmatpush1.bf16.msra.mxu0 %v2035_v8  ;;  %1999 = vmatpush1.bf16.msra.mxu1 %v2035_v8  ;;  %v2120_v4 = vld [vmem:[%s2223_s5 + $0x1d4] ss:$8 sps:$4 sm:$0xff]   ;;  %v2123_v6 = vld [vmem:[%s2223_s5 + $0x1d0] ss:$8 sps:$4 sm:$0xff]   ;;  %v2124_v7 = vld [vmem:[%s2223_s5 + $0xe4] ss:$8 sps:$4 sm:$0xff]  }
  0x23   : > { %814 = vmatprep.subr.bf16.mxu0 %v2160_v1  ;;  %1990 = vmatprep.subr.bf16.mxu1 %v2160_v1  ;;  %v2126_v8 = vld [vmem:[%s2223_s5 + $0x1e4] ss:$8 sps:$4 sm:$0xff]   ;;  %v2129_v10 = vld [vmem:[%s2223_s5 + $0x1e0] ss:$8 sps:$4 sm:$0xff]   ;;  %v2130_v11 = vld [vmem:[%s2223_s5 + $0xf4] ss:$8 sps:$4 sm:$0xff]  }
  0x24   : > { %v2134_v13 = vld [vmem:[%s2223_s5 + $0xf0] ss:$8 sps:$4 sm:$0xff]  }
  0x25   : > { %v2135_v14 = vld [vmem:[%s2223_s5 + $0x1f0] ss:$8 sps:$4 sm:$0xff]  }
  0x26   : > { %815 = vmatpush1.bf16.msra.mxu0 %v2036_v9  ;;  %2000 = vmatpush1.bf16.msra.mxu1 %v2036_v9  ;;  %v2128_v9 = vld [vmem:[%s2223_s5 + $0xe0] ss:$8 sps:$4 sm:$0xff]  }
  0x27   : > { %816 = vmatprep.subr.bf16.mxu0 %v2160_v1  ;;  %1991 = vmatprep.subr.bf16.mxu1 %v2160_v1 }
  0x2a   : > { %817 = vmatpush1.bf16.msra.mxu0 %v2037_v12  ;;  %2001 = vmatpush1.bf16.msra.mxu1 %v2037_v12  ;;  %v2132_v12 = vld [vmem:[%s2223_s5 + $0x1f4] ss:$8 sps:$4 sm:$0xff]  }
  0x2b   : > { %830 = vmatprep.subr.bf16.mxu0 %v2160_v1  ;;  %1992 = vmatprep.subr.bf16.mxu1 %v2160_v1 }
  0x2e   : > { %831 = vmatpush2.bf16.msra.mxu0 %v800_v15  ;;  %2002 = vmatpush2.bf16.msra.mxu1 %v800_v15  ;;  %v2342_v15 = vld [vmem:[%s2622_s2] ss:$0 sm:$0xff] }
  0x2f   : > { %832 = vmatprep.subr.bf16.mxu0 %v2160_v1  ;;  %1993 = vmatprep.subr.bf16.mxu1 %v2160_v1  ;;  %v2116_v1 = vld [vmem:[%s2223_s5 + $0xc0] ss:$8 sps:$4 sm:$0xff]  }
  0x32   : > { %833 = vmatpush2.bf16.msra.mxu0 %v2039_v16  ;;  %2003 = vmatpush2.bf16.msra.mxu1 %v2039_v16 }
  0x35   : > { %835 = vmatmul.mubr.bf16.vlgmr.msra.gmra.mxu0 %v2040_v17  ;;  %963 = vmatmul.mubr.bf16.vlgmr.msra.gmra.mxu1 %v2043_v18  ;;  %v2347_v17 = vld [vmem:[%s2623_s3] ss:$0 sm:$0xff] }
  0x36   : > { %1820 = vmatprep.mubr.msk.bf16.mxu0 %vm698_vm0, %v2046_v19  ;;  %1836 = vmatprep.mubr.msk.bf16.mxu1 %vm698_vm0, %v2048_v20 }
  0x3d   : > { %843 = vmatmul.mubr.bf16.gmra.mxu0 %v2050_v21  ;;  %971 = vmatmul.mubr.bf16.gmra.mxu1 %v2051_v22 }
  0x3e   : > { %1821 = vmatprep.mubr.msk.bf16.mxu0 %vm698_vm0, %v2052_v23  ;;  %1837 = vmatprep.mubr.msk.bf16.mxu1 %vm698_vm0, %v2054_v24 }
  0x45   : > { %851 = vmatmul.mubr.bf16.gmra.mxu0 %v2056_v25  ;;  %979 = vmatmul.mubr.bf16.gmra.mxu1 %v2057_v26 }
  0x46   : > { %1822 = vmatprep.mubr.msk.bf16.mxu0 %vm698_vm0, %v2058_v27  ;;  %1838 = vmatprep.mubr.msk.bf16.mxu1 %vm698_vm0, %v2060_v28 }
  0x4d   : > { %859 = vmatmul.mubr.bf16.gmra.mxu0 %v2062_v29  ;;  %987 = vmatmul.mubr.bf16.gmra.mxu1 %v2063_v30 }
  0x4e   : > { %1823 = vmatprep.mubr.msk.bf16.mxu0 %vm698_vm0, %v2064_v31  ;;  %1839 = vmatprep.mubr.msk.bf16.mxu1 %vm698_vm0, %v2066_v32 }
  0x55   : > { %867 = vmatmul.mubr.bf16.gmra.mxu0 %v2068_v33  ;;  %995 = vmatmul.mubr.bf16.gmra.mxu1 %v2069_v34 }
  0x56   : > { %1824 = vmatprep.mubr.msk.bf16.mxu0 %vm698_vm0, %v2070_v35  ;;  %1840 = vmatprep.mubr.msk.bf16.mxu1 %vm698_vm0, %v2072_v36 }
  0x5d   : > { %875 = vmatmul.mubr.bf16.gmra.mxu0 %v2074_v37  ;;  %1003 = vmatmul.mubr.bf16.gmra.mxu1 %v2075_v38 }
  0x5e   : > { %1825 = vmatprep.mubr.msk.bf16.mxu0 %vm698_vm0, %v2076_v39  ;;  %1841 = vmatprep.mubr.msk.bf16.mxu1 %vm698_vm0, %v2078_v40 }
  0x65   : > { %883 = vmatmul.mubr.bf16.gmra.mxu0 %v2080_v41  ;;  %1011 = vmatmul.mubr.bf16.gmra.mxu1 %v2081_v42 }
  0x66   : > { %1826 = vmatprep.mubr.msk.bf16.mxu0 %vm698_vm0, %v2082_v43  ;;  %1842 = vmatprep.mubr.msk.bf16.mxu1 %vm698_vm0, %v2084_v44 }
  0x6d   : > { %891 = vmatmul.mubr.bf16.gmra.mxu0 %v2086_v45  ;;  %1019 = vmatmul.mubr.bf16.gmra.mxu1 %v2087_v46 }
  0x6e   : > { %1827 = vmatprep.mubr.msk.bf16.mxu0 %vm698_vm0, %v2088_v47  ;;  %1843 = vmatprep.mubr.msk.bf16.mxu1 %vm698_vm0, %v2090_v48 }
  0x75   : > { %899 = vmatmul.mubr.bf16.gmra.mxu0 %v2092_v49  ;;  %1027 = vmatmul.mubr.bf16.gmra.mxu1 %v2093_v50 }
  0x76   : > { %1828 = vmatprep.mubr.msk.bf16.mxu0 %vm698_vm0, %v2094_v51  ;;  %1844 = vmatprep.mubr.msk.bf16.mxu1 %vm698_vm0, %v2096_v52 }
  0x7d   : > { %907 = vmatmul.mubr.bf16.gmra.mxu0 %v2098_v53  ;;  %1035 = vmatmul.mubr.bf16.gmra.mxu1 %v2099_v54 }
  0x7e   : > { %1829 = vmatprep.mubr.msk.bf16.mxu0 %vm698_vm0, %v2100_v55  ;;  %1845 = vmatprep.mubr.msk.bf16.mxu1 %vm698_vm0, %v2102_v56 }
  0x85   : > { %915 = vmatmul.mubr.bf16.gmra.mxu0 %v2104_v57  ;;  %1043 = vmatmul.mubr.bf16.gmra.mxu1 %v2105_v58 }
  0x86   : > { %1830 = vmatprep.mubr.msk.bf16.mxu0 %vm698_vm0, %v2106_v59  ;;  %1846 = vmatprep.mubr.msk.bf16.mxu1 %vm698_vm0, %v2108_v60 }
  0x8d   : > { %923 = vmatmul.mubr.bf16.gmra.mxu0 %v2110_v61  ;;  %1051 = vmatmul.mubr.bf16.gmra.mxu1 %v2111_v62 }
  0x8e   : > { %1831 = vmatprep.mubr.msk.bf16.mxu0 %vm698_vm0, %v2112_v63  ;;  %1847 = vmatprep.mubr.msk.bf16.mxu1 %vm698_vm0, %v2114_v0 }
  0x95   : > { %931 = vmatmul.mubr.bf16.gmra.mxu0 %v2116_v1  ;;  %1059 = vmatmul.mubr.bf16.gmra.mxu1 %v2117_v2 }
  0x96   : > { %1832 = vmatprep.mubr.msk.bf16.mxu0 %vm698_vm0, %v2118_v3  ;;  %1848 = vmatprep.mubr.msk.bf16.mxu1 %vm698_vm0, %v2120_v4 }
  0x9d   : > { %939 = vmatmul.mubr.bf16.gmra.mxu0 %v2122_v5  ;;  %1067 = vmatmul.mubr.bf16.gmra.mxu1 %v2123_v6 }
  0x9e   : > { %1833 = vmatprep.mubr.msk.bf16.mxu0 %vm698_vm0, %v2124_v7  ;;  %1849 = vmatprep.mubr.msk.bf16.mxu1 %vm698_vm0, %v2126_v8 }
  0xa5   : > { %947 = vmatmul.mubr.bf16.gmra.mxu0 %v2128_v9  ;;  %1075 = vmatmul.mubr.bf16.gmra.mxu1 %v2129_v10 }
  0xa6   : > { %1834 = vmatprep.mubr.msk.bf16.mxu0 %vm698_vm0, %v2130_v11  ;;  %1850 = vmatprep.mubr.msk.bf16.mxu1 %vm698_vm0, %v2132_v12 }
  0xad   : > { %955 = vmatmul.mubr.bf16.gmra.mxu0 %v2134_v13  ;;  %1083 = vmatmul.mubr.bf16.gmra.mxu1 %v2135_v14 }
  0xf5   : > { %v836_v16 = vpop.f32.mrf.mxu0  ;;  %v964_v18 = vpop.f32.mrf.mxu1 }
  0xf6   : > { %v1098_v19 = vmul.f32 %v2342_v15, %v836_v16  ;;  %v1130_v20 = vmul.f32 %v2342_v15, %v964_v18 }
  0xf7   : > { %v838_v21 = vpop.f32.mrf.mxu0  ;;  %v966_v22 = vpop.f32.mrf.mxu1 }
  0xf8   : > { %v1169_v23 = vadd.f32 %v2347_v17, %v1098_v19  ;;  %v1201_v24 = vadd.f32 %v2347_v17, %v1130_v20 }
  0xf9   : > { %v839_v25 = vpop.f32.mrf.mxu0  ;;  %v967_v26 = vpop.f32.mrf.mxu1 }
  0xfa   : > { %v1233_v27 = vmax.f32 %v1169_v23, 0.0  ;;  %v1265_v28 = vmax.f32 %v1201_v24, 0.0  ;;  %v1099_v29 = vmul.f32 %v2342_v15, %v839_v25  ;;  %v1131_v30 = vmul.f32 %v2342_v15, %v967_v26 }
  0xfb   : > { %v841_v31 = vpop.f32.mrf.mxu0  ;;  %v969_v32 = vpop.f32.mrf.mxu1 }
  0xfc   : > { %v1920_v33 = vpack.c.bf16 %v1233_v27, %v1233_v27  ;;  %v1952_v34 = vpack.c.bf16 %v1265_v28, %v1265_v28  ;;  %v1170_v35 = vadd.f32 %v2347_v17, %v1099_v29  ;;  %v1202_v36 = vadd.f32 %v2347_v17, %v1131_v30 }
  0xfd   : > { %v844_v37 = vpop.f32.mrf.mxu0  ;;  %v972_v38 = vpop.f32.mrf.mxu1 }
  0xfe   : > { %1554 = vst.msk [vmem:[%s2359_s29] sm:$0xf] %vm1553_vm3, %v1920_v33  ;;  %1586 = vst.msk [vmem:[%s2359_s29 + $0x80] sm:$0xf] %vm1553_vm3, %v1952_v34  ;;  %v1234_v39 = vmax.f32 %v1170_v35, 0.0  ;;  %v1266_v40 = vmax.f32 %v1202_v36, 0.0  ;;  %v1100_v41 = vmul.f32 %v2342_v15, %v844_v37  ;;  %v1132_v42 = vmul.f32 %v2342_v15, %v972_v38 }
  0xff   : > { %v846_v43 = vpop.f32.mrf.mxu0  ;;  %v974_v44 = vpop.f32.mrf.mxu1 }
 0x100   : > { %v1921_v45 = vpack.c.bf16 %v1234_v39, %v1234_v39  ;;  %v1953_v46 = vpack.c.bf16 %v1266_v40, %v1266_v40  ;;  %v1171_v47 = vadd.f32 %v2347_v17, %v1100_v41  ;;  %v1203_v48 = vadd.f32 %v2347_v17, %v1132_v42 }
 0x101   : > { %v847_v49 = vpop.f32.mrf.mxu0  ;;  %v975_v50 = vpop.f32.mrf.mxu1 }
 0x102   : > { %1555 = vst.msk [vmem:[%s2359_s29 + $0x4] sm:$0xf] %vm1553_vm3, %v1921_v45  ;;  %1587 = vst.msk [vmem:[%s2359_s29 + $0x84] sm:$0xf] %vm1553_vm3, %v1953_v46  ;;  %v1235_v51 = vmax.f32 %v1171_v47, 0.0  ;;  %v1267_v52 = vmax.f32 %v1203_v48, 0.0  ;;  %v1101_v53 = vmul.f32 %v2342_v15, %v847_v49  ;;  %v1133_v54 = vmul.f32 %v2342_v15, %v975_v50 }
 0x103   : > { %v849_v55 = vpop.f32.mrf.mxu0  ;;  %v977_v56 = vpop.f32.mrf.mxu1 }
 0x104   : > { %v1922_v57 = vpack.c.bf16 %v1235_v51, %v1235_v51  ;;  %v1954_v58 = vpack.c.bf16 %v1267_v52, %v1267_v52  ;;  %v1172_v59 = vadd.f32 %v2347_v17, %v1101_v53  ;;  %v1204_v60 = vadd.f32 %v2347_v17, %v1133_v54 }
 0x105   : > { %v852_v61 = vpop.f32.mrf.mxu0  ;;  %v980_v62 = vpop.f32.mrf.mxu1 }
 0x106   : > { %1556 = vst.msk [vmem:[%s2359_s29 + $0x8] sm:$0xf] %vm1553_vm3, %v1922_v57  ;;  %1588 = vst.msk [vmem:[%s2359_s29 + $0x88] sm:$0xf] %vm1553_vm3, %v1954_v58  ;;  %v1236_v63 = vmax.f32 %v1172_v59, 0.0  ;;  %v1268_v0 = vmax.f32 %v1204_v60, 0.0  ;;  %v1102_v1 = vmul.f32 %v2342_v15, %v852_v61  ;;  %v1134_v2 = vmul.f32 %v2342_v15, %v980_v62 }
 0x107   : > { %v854_v3 = vpop.f32.mrf.mxu0  ;;  %v982_v4 = vpop.f32.mrf.mxu1 }
 0x108   : > { %v1923_v5 = vpack.c.bf16 %v1236_v63, %v1236_v63  ;;  %v1955_v6 = vpack.c.bf16 %v1268_v0, %v1268_v0  ;;  %v1173_v7 = vadd.f32 %v2347_v17, %v1102_v1  ;;  %v1205_v8 = vadd.f32 %v2347_v17, %v1134_v2 }
 0x109   : > { %v855_v9 = vpop.f32.mrf.mxu0  ;;  %v983_v10 = vpop.f32.mrf.mxu1 }
 0x10a   : > { %1557 = vst.msk [vmem:[%s2359_s29 + $0xc] sm:$0xf] %vm1553_vm3, %v1923_v5  ;;  %1589 = vst.msk [vmem:[%s2359_s29 + $0x8c] sm:$0xf] %vm1553_vm3, %v1955_v6  ;;  %v1237_v11 = vmax.f32 %v1173_v7, 0.0  ;;  %v1269_v12 = vmax.f32 %v1205_v8, 0.0  ;;  %v1103_v13 = vmul.f32 %v2342_v15, %v855_v9  ;;  %v1135_v14 = vmul.f32 %v2342_v15, %v983_v10 }
 0x10b   : > { %v857_v16 = vpop.f32.mrf.mxu0  ;;  %v985_v18 = vpop.f32.mrf.mxu1 }
 0x10c   : > { %v1924_v19 = vpack.c.bf16 %v1237_v11, %v1237_v11  ;;  %v1956_v20 = vpack.c.bf16 %v1269_v12, %v1269_v12  ;;  %v1174_v21 = vadd.f32 %v2347_v17, %v1103_v13  ;;  %v1206_v22 = vadd.f32 %v2347_v17, %v1135_v14 }
 0x10d   : > { %v860_v23 = vpop.f32.mrf.mxu0  ;;  %v988_v24 = vpop.f32.mrf.mxu1 }
 0x10e   : > { %1558 = vst.msk [vmem:[%s2359_s29 + $0x10] sm:$0xf] %vm1553_vm3, %v1924_v19  ;;  %1590 = vst.msk [vmem:[%s2359_s29 + $0x90] sm:$0xf] %vm1553_vm3, %v1956_v20  ;;  %v1238_v25 = vmax.f32 %v1174_v21, 0.0  ;;  %v1270_v26 = vmax.f32 %v1206_v22, 0.0  ;;  %v1104_v27 = vmul.f32 %v2342_v15, %v860_v23  ;;  %v1136_v28 = vmul.f32 %v2342_v15, %v988_v24 }
 0x10f   : > { %v862_v29 = vpop.f32.mrf.mxu0  ;;  %v990_v30 = vpop.f32.mrf.mxu1 }
 0x110   : > { %v1925_v31 = vpack.c.bf16 %v1238_v25, %v1238_v25  ;;  %v1957_v32 = vpack.c.bf16 %v1270_v26, %v1270_v26  ;;  %v1175_v33 = vadd.f32 %v2347_v17, %v1104_v27  ;;  %v1207_v34 = vadd.f32 %v2347_v17, %v1136_v28 }
 0x111   : > { %v863_v35 = vpop.f32.mrf.mxu0  ;;  %v991_v36 = vpop.f32.mrf.mxu1 }
 0x112   : > { %1559 = vst.msk [vmem:[%s2359_s29 + $0x14] sm:$0xf] %vm1553_vm3, %v1925_v31  ;;  %1591 = vst.msk [vmem:[%s2359_s29 + $0x94] sm:$0xf] %vm1553_vm3, %v1957_v32  ;;  %v1239_v37 = vmax.f32 %v1175_v33, 0.0  ;;  %v1271_v38 = vmax.f32 %v1207_v34, 0.0  ;;  %v1105_v39 = vmul.f32 %v2342_v15, %v863_v35  ;;  %v1137_v40 = vmul.f32 %v2342_v15, %v991_v36 }
 0x113   : > { %v865_v41 = vpop.f32.mrf.mxu0  ;;  %v993_v42 = vpop.f32.mrf.mxu1 }
 0x114   : > { %v1926_v43 = vpack.c.bf16 %v1239_v37, %v1239_v37  ;;  %v1958_v44 = vpack.c.bf16 %v1271_v38, %v1271_v38  ;;  %v1176_v45 = vadd.f32 %v2347_v17, %v1105_v39  ;;  %v1208_v46 = vadd.f32 %v2347_v17, %v1137_v40 }
 0x115   : > { %v868_v47 = vpop.f32.mrf.mxu0  ;;  %v996_v48 = vpop.f32.mrf.mxu1 }
 0x116   : > { %1560 = vst.msk [vmem:[%s2359_s29 + $0x18] sm:$0xf] %vm1553_vm3, %v1926_v43  ;;  %1592 = vst.msk [vmem:[%s2359_s29 + $0x98] sm:$0xf] %vm1553_vm3, %v1958_v44  ;;  %v1240_v49 = vmax.f32 %v1176_v45, 0.0  ;;  %v1272_v50 = vmax.f32 %v1208_v46, 0.0  ;;  %v1106_v51 = vmul.f32 %v2342_v15, %v868_v47  ;;  %v1138_v52 = vmul.f32 %v2342_v15, %v996_v48 }
 0x117   : > { %v870_v53 = vpop.f32.mrf.mxu0  ;;  %v998_v54 = vpop.f32.mrf.mxu1 }
 0x118   : > { %v1927_v55 = vpack.c.bf16 %v1240_v49, %v1240_v49  ;;  %v1959_v56 = vpack.c.bf16 %v1272_v50, %v1272_v50  ;;  %v1177_v57 = vadd.f32 %v2347_v17, %v1106_v51  ;;  %v1209_v58 = vadd.f32 %v2347_v17, %v1138_v52 }
 0x119   : > { %v871_v59 = vpop.f32.mrf.mxu0  ;;  %v999_v60 = vpop.f32.mrf.mxu1 }
 0x11a   : > { %1561 = vst.msk [vmem:[%s2359_s29 + $0x1c] sm:$0xf] %vm1553_vm3, %v1927_v55  ;;  %1593 = vst.msk [vmem:[%s2359_s29 + $0x9c] sm:$0xf] %vm1553_vm3, %v1959_v56  ;;  %v1241_v61 = vmax.f32 %v1177_v57, 0.0  ;;  %v1273_v62 = vmax.f32 %v1209_v58, 0.0  ;;  %v1107_v63 = vmul.f32 %v2342_v15, %v871_v59  ;;  %v1139_v0 = vmul.f32 %v2342_v15, %v999_v60 }
 0x11b   : > { %v873_v1 = vpop.f32.mrf.mxu0  ;;  %v1001_v2 = vpop.f32.mrf.mxu1 }
 0x11c   : > { %v1928_v3 = vpack.c.bf16 %v1241_v61, %v1241_v61  ;;  %v1960_v4 = vpack.c.bf16 %v1273_v62, %v1273_v62  ;;  %v1178_v5 = vadd.f32 %v2347_v17, %v1107_v63  ;;  %v1210_v6 = vadd.f32 %v2347_v17, %v1139_v0 }
 0x11d   : > { %v876_v7 = vpop.f32.mrf.mxu0  ;;  %v1004_v8 = vpop.f32.mrf.mxu1 }
 0x11e   : > { %1562 = vst.msk [vmem:[%s2359_s29 + $0x20] sm:$0xf] %vm1553_vm3, %v1928_v3  ;;  %1594 = vst.msk [vmem:[%s2359_s29 + $0xa0] sm:$0xf] %vm1553_vm3, %v1960_v4  ;;  %v1242_v9 = vmax.f32 %v1178_v5, 0.0  ;;  %v1274_v10 = vmax.f32 %v1210_v6, 0.0  ;;  %v1108_v11 = vmul.f32 %v2342_v15, %v876_v7  ;;  %v1140_v12 = vmul.f32 %v2342_v15, %v1004_v8 }
 0x11f   : > { %v878_v13 = vpop.f32.mrf.mxu0  ;;  %v1006_v14 = vpop.f32.mrf.mxu1 }
 0x120   : > { %v1929_v16 = vpack.c.bf16 %v1242_v9, %v1242_v9  ;;  %v1961_v18 = vpack.c.bf16 %v1274_v10, %v1274_v10  ;;  %v1179_v19 = vadd.f32 %v2347_v17, %v1108_v11  ;;  %v1211_v20 = vadd.f32 %v2347_v17, %v1140_v12 }
 0x121   : > { %v879_v21 = vpop.f32.mrf.mxu0  ;;  %v1007_v22 = vpop.f32.mrf.mxu1 }
 0x122   : > { %1563 = vst.msk [vmem:[%s2359_s29 + $0x24] sm:$0xf] %vm1553_vm3, %v1929_v16  ;;  %1595 = vst.msk [vmem:[%s2359_s29 + $0xa4] sm:$0xf] %vm1553_vm3, %v1961_v18  ;;  %v1243_v23 = vmax.f32 %v1179_v19, 0.0  ;;  %v1275_v24 = vmax.f32 %v1211_v20, 0.0  ;;  %v1109_v25 = vmul.f32 %v2342_v15, %v879_v21  ;;  %v1141_v26 = vmul.f32 %v2342_v15, %v1007_v22 }
 0x123   : > { %v881_v27 = vpop.f32.mrf.mxu0  ;;  %v1009_v28 = vpop.f32.mrf.mxu1 }
 0x124   : > { %v1930_v29 = vpack.c.bf16 %v1243_v23, %v1243_v23  ;;  %v1962_v30 = vpack.c.bf16 %v1275_v24, %v1275_v24  ;;  %v1180_v31 = vadd.f32 %v2347_v17, %v1109_v25  ;;  %v1212_v32 = vadd.f32 %v2347_v17, %v1141_v26 }
 0x125   : > { %v884_v33 = vpop.f32.mrf.mxu0  ;;  %v1012_v34 = vpop.f32.mrf.mxu1 }
 0x126   : > { %1564 = vst.msk [vmem:[%s2359_s29 + $0x28] sm:$0xf] %vm1553_vm3, %v1930_v29  ;;  %1596 = vst.msk [vmem:[%s2359_s29 + $0xa8] sm:$0xf] %vm1553_vm3, %v1962_v30  ;;  %v1244_v35 = vmax.f32 %v1180_v31, 0.0  ;;  %v1276_v36 = vmax.f32 %v1212_v32, 0.0  ;;  %v1110_v37 = vmul.f32 %v2342_v15, %v884_v33  ;;  %v1142_v38 = vmul.f32 %v2342_v15, %v1012_v34 }
 0x127   : > { %v886_v39 = vpop.f32.mrf.mxu0  ;;  %v1014_v40 = vpop.f32.mrf.mxu1 }
 0x128   : > { %v1931_v41 = vpack.c.bf16 %v1244_v35, %v1244_v35  ;;  %v1963_v42 = vpack.c.bf16 %v1276_v36, %v1276_v36  ;;  %v1181_v43 = vadd.f32 %v2347_v17, %v1110_v37  ;;  %v1213_v44 = vadd.f32 %v2347_v17, %v1142_v38 }
 0x129   : > { %v887_v45 = vpop.f32.mrf.mxu0  ;;  %v1015_v46 = vpop.f32.mrf.mxu1 }
 0x12a   : > { %1565 = vst.msk [vmem:[%s2359_s29 + $0x2c] sm:$0xf] %vm1553_vm3, %v1931_v41  ;;  %1597 = vst.msk [vmem:[%s2359_s29 + $0xac] sm:$0xf] %vm1553_vm3, %v1963_v42  ;;  %v1245_v47 = vmax.f32 %v1181_v43, 0.0  ;;  %v1277_v48 = vmax.f32 %v1213_v44, 0.0  ;;  %v1111_v49 = vmul.f32 %v2342_v15, %v887_v45  ;;  %v1143_v50 = vmul.f32 %v2342_v15, %v1015_v46 }
 0x12b   : > { %v889_v51 = vpop.f32.mrf.mxu0  ;;  %v1017_v52 = vpop.f32.mrf.mxu1 }
 0x12c   : > { %v1932_v53 = vpack.c.bf16 %v1245_v47, %v1245_v47  ;;  %v1964_v54 = vpack.c.bf16 %v1277_v48, %v1277_v48  ;;  %v1182_v55 = vadd.f32 %v2347_v17, %v1111_v49  ;;  %v1214_v56 = vadd.f32 %v2347_v17, %v1143_v50 }
 0x12d   : > { %v892_v57 = vpop.f32.mrf.mxu0  ;;  %v1020_v58 = vpop.f32.mrf.mxu1 }
 0x12e   : > { %1566 = vst.msk [vmem:[%s2359_s29 + $0x30] sm:$0xf] %vm1553_vm3, %v1932_v53  ;;  %1598 = vst.msk [vmem:[%s2359_s29 + $0xb0] sm:$0xf] %vm1553_vm3, %v1964_v54  ;;  %v1246_v59 = vmax.f32 %v1182_v55, 0.0  ;;  %v1278_v60 = vmax.f32 %v1214_v56, 0.0  ;;  %v1112_v61 = vmul.f32 %v2342_v15, %v892_v57  ;;  %v1144_v62 = vmul.f32 %v2342_v15, %v1020_v58 }
 0x12f   : > { %v894_v63 = vpop.f32.mrf.mxu0  ;;  %v1022_v0 = vpop.f32.mrf.mxu1 }
 0x130   : > { %v1933_v1 = vpack.c.bf16 %v1246_v59, %v1246_v59  ;;  %v1965_v2 = vpack.c.bf16 %v1278_v60, %v1278_v60  ;;  %v1183_v3 = vadd.f32 %v2347_v17, %v1112_v61  ;;  %v1215_v4 = vadd.f32 %v2347_v17, %v1144_v62 }
 0x131   : > { %v895_v5 = vpop.f32.mrf.mxu0  ;;  %v1023_v6 = vpop.f32.mrf.mxu1 }
 0x132   : > { %1567 = vst.msk [vmem:[%s2359_s29 + $0x34] sm:$0xf] %vm1553_vm3, %v1933_v1  ;;  %1599 = vst.msk [vmem:[%s2359_s29 + $0xb4] sm:$0xf] %vm1553_vm3, %v1965_v2  ;;  %v1247_v7 = vmax.f32 %v1183_v3, 0.0  ;;  %v1279_v8 = vmax.f32 %v1215_v4, 0.0  ;;  %v1113_v9 = vmul.f32 %v2342_v15, %v895_v5  ;;  %v1145_v10 = vmul.f32 %v2342_v15, %v1023_v6 }
 0x133   : > { %v897_v11 = vpop.f32.mrf.mxu0  ;;  %v1025_v12 = vpop.f32.mrf.mxu1 }
 0x134   : > { %v1934_v13 = vpack.c.bf16 %v1247_v7, %v1247_v7  ;;  %v1966_v14 = vpack.c.bf16 %v1279_v8, %v1279_v8  ;;  %v1184_v16 = vadd.f32 %v2347_v17, %v1113_v9  ;;  %v1216_v18 = vadd.f32 %v2347_v17, %v1145_v10 }
 0x135   : > { %v900_v19 = vpop.f32.mrf.mxu0  ;;  %v1028_v20 = vpop.f32.mrf.mxu1 }
 0x136   : > { %1568 = vst.msk [vmem:[%s2359_s29 + $0x38] sm:$0xf] %vm1553_vm3, %v1934_v13  ;;  %1600 = vst.msk [vmem:[%s2359_s29 + $0xb8] sm:$0xf] %vm1553_vm3, %v1966_v14  ;;  %v1248_v21 = vmax.f32 %v1184_v16, 0.0  ;;  %v1280_v22 = vmax.f32 %v1216_v18, 0.0  ;;  %v1114_v23 = vmul.f32 %v2342_v15, %v900_v19  ;;  %v1146_v24 = vmul.f32 %v2342_v15, %v1028_v20 }
 0x137   : > { %v902_v25 = vpop.f32.mrf.mxu0  ;;  %v1030_v26 = vpop.f32.mrf.mxu1 }
 0x138   : > { %v1935_v27 = vpack.c.bf16 %v1248_v21, %v1248_v21  ;;  %v1967_v28 = vpack.c.bf16 %v1280_v22, %v1280_v22  ;;  %v1185_v29 = vadd.f32 %v2347_v17, %v1114_v23  ;;  %v1217_v30 = vadd.f32 %v2347_v17, %v1146_v24 }
 0x139   : > { %v903_v31 = vpop.f32.mrf.mxu0  ;;  %v1031_v32 = vpop.f32.mrf.mxu1 }
 0x13a   : > { %1569 = vst.msk [vmem:[%s2359_s29 + $0x3c] sm:$0xf] %vm1553_vm3, %v1935_v27  ;;  %1601 = vst.msk [vmem:[%s2359_s29 + $0xbc] sm:$0xf] %vm1553_vm3, %v1967_v28  ;;  %v1249_v33 = vmax.f32 %v1185_v29, 0.0  ;;  %v1281_v34 = vmax.f32 %v1217_v30, 0.0  ;;  %v1115_v35 = vmul.f32 %v2342_v15, %v903_v31  ;;  %v1147_v36 = vmul.f32 %v2342_v15, %v1031_v32 }
 0x13b   : > { %v905_v37 = vpop.f32.mrf.mxu0  ;;  %v1033_v38 = vpop.f32.mrf.mxu1 }
 0x13c   : > { %v1936_v39 = vpack.c.bf16 %v1249_v33, %v1249_v33  ;;  %v1968_v40 = vpack.c.bf16 %v1281_v34, %v1281_v34  ;;  %v1186_v41 = vadd.f32 %v2347_v17, %v1115_v35  ;;  %v1218_v42 = vadd.f32 %v2347_v17, %v1147_v36 }
 0x13d   : > { %v908_v43 = vpop.f32.mrf.mxu0  ;;  %v1036_v44 = vpop.f32.mrf.mxu1 }
 0x13e   : > { %1570 = vst.msk [vmem:[%s2359_s29 + $0x40] sm:$0xf] %vm1553_vm3, %v1936_v39  ;;  %1602 = vst.msk [vmem:[%s2359_s29 + $0xc0] sm:$0xf] %vm1553_vm3, %v1968_v40  ;;  %v1250_v45 = vmax.f32 %v1186_v41, 0.0  ;;  %v1282_v46 = vmax.f32 %v1218_v42, 0.0  ;;  %v1116_v47 = vmul.f32 %v2342_v15, %v908_v43  ;;  %v1148_v48 = vmul.f32 %v2342_v15, %v1036_v44 }
 0x13f   : > { %v910_v49 = vpop.f32.mrf.mxu0  ;;  %v1038_v50 = vpop.f32.mrf.mxu1 }
 0x140   : > { %v1937_v51 = vpack.c.bf16 %v1250_v45, %v1250_v45  ;;  %v1969_v52 = vpack.c.bf16 %v1282_v46, %v1282_v46  ;;  %v1187_v53 = vadd.f32 %v2347_v17, %v1116_v47  ;;  %v1219_v54 = vadd.f32 %v2347_v17, %v1148_v48 }
 0x141   : > { %v911_v55 = vpop.f32.mrf.mxu0  ;;  %v1039_v56 = vpop.f32.mrf.mxu1 }
 0x142   : > { %1571 = vst.msk [vmem:[%s2359_s29 + $0x44] sm:$0xf] %vm1553_vm3, %v1937_v51  ;;  %1603 = vst.msk [vmem:[%s2359_s29 + $0xc4] sm:$0xf] %vm1553_vm3, %v1969_v52  ;;  %v1251_v57 = vmax.f32 %v1187_v53, 0.0  ;;  %v1283_v58 = vmax.f32 %v1219_v54, 0.0  ;;  %v1117_v59 = vmul.f32 %v2342_v15, %v911_v55  ;;  %v1149_v60 = vmul.f32 %v2342_v15, %v1039_v56 }
 0x143   : > { %v913_v61 = vpop.f32.mrf.mxu0  ;;  %v1041_v62 = vpop.f32.mrf.mxu1 }
 0x144   : > { %v1938_v63 = vpack.c.bf16 %v1251_v57, %v1251_v57  ;;  %v1970_v0 = vpack.c.bf16 %v1283_v58, %v1283_v58  ;;  %v1188_v1 = vadd.f32 %v2347_v17, %v1117_v59  ;;  %v1220_v2 = vadd.f32 %v2347_v17, %v1149_v60 }
 0x145   : > { %v916_v3 = vpop.f32.mrf.mxu0  ;;  %v1044_v4 = vpop.f32.mrf.mxu1 }
 0x146   : > { %1572 = vst.msk [vmem:[%s2359_s29 + $0x48] sm:$0xf] %vm1553_vm3, %v1938_v63  ;;  %1604 = vst.msk [vmem:[%s2359_s29 + $0xc8] sm:$0xf] %vm1553_vm3, %v1970_v0  ;;  %v1252_v5 = vmax.f32 %v1188_v1, 0.0  ;;  %v1284_v6 = vmax.f32 %v1220_v2, 0.0  ;;  %v1118_v7 = vmul.f32 %v2342_v15, %v916_v3  ;;  %v1150_v8 = vmul.f32 %v2342_v15, %v1044_v4 }
 0x147   : > { %v918_v9 = vpop.f32.mrf.mxu0  ;;  %v1046_v10 = vpop.f32.mrf.mxu1 }
 0x148   : > { %v1939_v11 = vpack.c.bf16 %v1252_v5, %v1252_v5  ;;  %v1971_v12 = vpack.c.bf16 %v1284_v6, %v1284_v6  ;;  %v1189_v13 = vadd.f32 %v2347_v17, %v1118_v7  ;;  %v1221_v14 = vadd.f32 %v2347_v17, %v1150_v8 }
 0x149   : > { %v919_v16 = vpop.f32.mrf.mxu0  ;;  %v1047_v18 = vpop.f32.mrf.mxu1 }
 0x14a   : > { %1573 = vst.msk [vmem:[%s2359_s29 + $0x4c] sm:$0xf] %vm1553_vm3, %v1939_v11  ;;  %1605 = vst.msk [vmem:[%s2359_s29 + $0xcc] sm:$0xf] %vm1553_vm3, %v1971_v12  ;;  %v1253_v19 = vmax.f32 %v1189_v13, 0.0  ;;  %v1285_v20 = vmax.f32 %v1221_v14, 0.0  ;;  %v1119_v21 = vmul.f32 %v2342_v15, %v919_v16  ;;  %v1151_v22 = vmul.f32 %v2342_v15, %v1047_v18 }
 0x14b   : > { %v921_v23 = vpop.f32.mrf.mxu0  ;;  %v1049_v24 = vpop.f32.mrf.mxu1 }
 0x14c   : > { %v1940_v25 = vpack.c.bf16 %v1253_v19, %v1253_v19  ;;  %v1972_v26 = vpack.c.bf16 %v1285_v20, %v1285_v20  ;;  %v1190_v27 = vadd.f32 %v2347_v17, %v1119_v21  ;;  %v1222_v28 = vadd.f32 %v2347_v17, %v1151_v22 }
 0x14d   : > { %v924_v29 = vpop.f32.mrf.mxu0  ;;  %v1052_v30 = vpop.f32.mrf.mxu1 }
 0x14e   : > { %1574 = vst.msk [vmem:[%s2359_s29 + $0x50] sm:$0xf] %vm1553_vm3, %v1940_v25  ;;  %1606 = vst.msk [vmem:[%s2359_s29 + $0xd0] sm:$0xf] %vm1553_vm3, %v1972_v26  ;;  %v1254_v31 = vmax.f32 %v1190_v27, 0.0  ;;  %v1286_v32 = vmax.f32 %v1222_v28, 0.0  ;;  %v1120_v33 = vmul.f32 %v2342_v15, %v924_v29  ;;  %v1152_v34 = vmul.f32 %v2342_v15, %v1052_v30 }
 0x14f   : > { %v926_v35 = vpop.f32.mrf.mxu0  ;;  %v1054_v36 = vpop.f32.mrf.mxu1 }
 0x150   : > { %v1941_v37 = vpack.c.bf16 %v1254_v31, %v1254_v31  ;;  %v1973_v38 = vpack.c.bf16 %v1286_v32, %v1286_v32  ;;  %v1191_v39 = vadd.f32 %v2347_v17, %v1120_v33  ;;  %v1223_v40 = vadd.f32 %v2347_v17, %v1152_v34 }
 0x151   : > { %v927_v41 = vpop.f32.mrf.mxu0  ;;  %v1055_v42 = vpop.f32.mrf.mxu1 }
 0x152   : > { %1575 = vst.msk [vmem:[%s2359_s29 + $0x54] sm:$0xf] %vm1553_vm3, %v1941_v37  ;;  %1607 = vst.msk [vmem:[%s2359_s29 + $0xd4] sm:$0xf] %vm1553_vm3, %v1973_v38  ;;  %v1255_v43 = vmax.f32 %v1191_v39, 0.0  ;;  %v1287_v44 = vmax.f32 %v1223_v40, 0.0  ;;  %v1121_v45 = vmul.f32 %v2342_v15, %v927_v41  ;;  %v1153_v46 = vmul.f32 %v2342_v15, %v1055_v42 }
 0x153   : > { %v929_v47 = vpop.f32.mrf.mxu0  ;;  %v1057_v48 = vpop.f32.mrf.mxu1 }
 0x154   : > { %v1942_v49 = vpack.c.bf16 %v1255_v43, %v1255_v43  ;;  %v1974_v50 = vpack.c.bf16 %v1287_v44, %v1287_v44  ;;  %v1192_v51 = vadd.f32 %v2347_v17, %v1121_v45  ;;  %v1224_v52 = vadd.f32 %v2347_v17, %v1153_v46 }
 0x155   : > { %v932_v53 = vpop.f32.mrf.mxu0  ;;  %v1060_v54 = vpop.f32.mrf.mxu1 }
 0x156   : > { %1576 = vst.msk [vmem:[%s2359_s29 + $0x58] sm:$0xf] %vm1553_vm3, %v1942_v49  ;;  %1608 = vst.msk [vmem:[%s2359_s29 + $0xd8] sm:$0xf] %vm1553_vm3, %v1974_v50  ;;  %v1256_v55 = vmax.f32 %v1192_v51, 0.0  ;;  %v1288_v56 = vmax.f32 %v1224_v52, 0.0  ;;  %v1122_v57 = vmul.f32 %v2342_v15, %v932_v53  ;;  %v1154_v58 = vmul.f32 %v2342_v15, %v1060_v54 }
 0x157   : > { %v934_v59 = vpop.f32.mrf.mxu0  ;;  %v1062_v60 = vpop.f32.mrf.mxu1 }
 0x158   : > { %v1943_v61 = vpack.c.bf16 %v1256_v55, %v1256_v55  ;;  %v1975_v62 = vpack.c.bf16 %v1288_v56, %v1288_v56  ;;  %v1193_v63 = vadd.f32 %v2347_v17, %v1122_v57  ;;  %v1225_v0 = vadd.f32 %v2347_v17, %v1154_v58 }
 0x159   : > { %v935_v1 = vpop.f32.mrf.mxu0  ;;  %v1063_v2 = vpop.f32.mrf.mxu1 }
 0x15a   : > { %1577 = vst.msk [vmem:[%s2359_s29 + $0x5c] sm:$0xf] %vm1553_vm3, %v1943_v61  ;;  %1609 = vst.msk [vmem:[%s2359_s29 + $0xdc] sm:$0xf] %vm1553_vm3, %v1975_v62  ;;  %v1257_v3 = vmax.f32 %v1193_v63, 0.0  ;;  %v1289_v4 = vmax.f32 %v1225_v0, 0.0  ;;  %v1123_v5 = vmul.f32 %v2342_v15, %v935_v1  ;;  %v1155_v6 = vmul.f32 %v2342_v15, %v1063_v2 }
 0x15b   : > { %v937_v7 = vpop.f32.mrf.mxu0  ;;  %v1065_v8 = vpop.f32.mrf.mxu1 }
 0x15c   : > { %v1944_v9 = vpack.c.bf16 %v1257_v3, %v1257_v3  ;;  %v1976_v10 = vpack.c.bf16 %v1289_v4, %v1289_v4  ;;  %v1194_v11 = vadd.f32 %v2347_v17, %v1123_v5  ;;  %v1226_v12 = vadd.f32 %v2347_v17, %v1155_v6 }
 0x15d   : > { %v940_v13 = vpop.f32.mrf.mxu0  ;;  %v1068_v14 = vpop.f32.mrf.mxu1 }
 0x15e   : > { %1578 = vst.msk [vmem:[%s2359_s29 + $0x60] sm:$0xf] %vm1553_vm3, %v1944_v9  ;;  %1610 = vst.msk [vmem:[%s2359_s29 + $0xe0] sm:$0xf] %vm1553_vm3, %v1976_v10  ;;  %v1258_v16 = vmax.f32 %v1194_v11, 0.0  ;;  %v1290_v18 = vmax.f32 %v1226_v12, 0.0  ;;  %v1124_v19 = vmul.f32 %v2342_v15, %v940_v13  ;;  %v1156_v20 = vmul.f32 %v2342_v15, %v1068_v14 }
 0x15f   : > { %v942_v21 = vpop.f32.mrf.mxu0  ;;  %v1070_v22 = vpop.f32.mrf.mxu1 }
 0x160   : > { %v1945_v23 = vpack.c.bf16 %v1258_v16, %v1258_v16  ;;  %v1977_v24 = vpack.c.bf16 %v1290_v18, %v1290_v18  ;;  %v1195_v25 = vadd.f32 %v2347_v17, %v1124_v19  ;;  %v1227_v26 = vadd.f32 %v2347_v17, %v1156_v20 }
 0x161   : > { %v943_v27 = vpop.f32.mrf.mxu0  ;;  %v1071_v28 = vpop.f32.mrf.mxu1 }
 0x162   : > { %1579 = vst.msk [vmem:[%s2359_s29 + $0x64] sm:$0xf] %vm1553_vm3, %v1945_v23  ;;  %1611 = vst.msk [vmem:[%s2359_s29 + $0xe4] sm:$0xf] %vm1553_vm3, %v1977_v24  ;;  %v1259_v29 = vmax.f32 %v1195_v25, 0.0  ;;  %v1291_v30 = vmax.f32 %v1227_v26, 0.0  ;;  %v1125_v31 = vmul.f32 %v2342_v15, %v943_v27  ;;  %v1157_v32 = vmul.f32 %v2342_v15, %v1071_v28 }
 0x163   : > { %v945_v33 = vpop.f32.mrf.mxu0  ;;  %v1073_v34 = vpop.f32.mrf.mxu1 }
 0x164   : > { %v1946_v35 = vpack.c.bf16 %v1259_v29, %v1259_v29  ;;  %v1978_v36 = vpack.c.bf16 %v1291_v30, %v1291_v30  ;;  %v1196_v37 = vadd.f32 %v2347_v17, %v1125_v31  ;;  %v1228_v38 = vadd.f32 %v2347_v17, %v1157_v32 }
 0x165   : > { %v948_v39 = vpop.f32.mrf.mxu0  ;;  %v1076_v40 = vpop.f32.mrf.mxu1 }
 0x166   : > { %1580 = vst.msk [vmem:[%s2359_s29 + $0x68] sm:$0xf] %vm1553_vm3, %v1946_v35  ;;  %1612 = vst.msk [vmem:[%s2359_s29 + $0xe8] sm:$0xf] %vm1553_vm3, %v1978_v36  ;;  %v1260_v41 = vmax.f32 %v1196_v37, 0.0  ;;  %v1292_v42 = vmax.f32 %v1228_v38, 0.0  ;;  %v1126_v43 = vmul.f32 %v2342_v15, %v948_v39  ;;  %v1158_v44 = vmul.f32 %v2342_v15, %v1076_v40 }
 0x167   : > { %v950_v45 = vpop.f32.mrf.mxu0  ;;  %v1078_v46 = vpop.f32.mrf.mxu1 }
 0x168   : > { %v1947_v47 = vpack.c.bf16 %v1260_v41, %v1260_v41  ;;  %v1979_v48 = vpack.c.bf16 %v1292_v42, %v1292_v42  ;;  %v1197_v49 = vadd.f32 %v2347_v17, %v1126_v43  ;;  %v1229_v50 = vadd.f32 %v2347_v17, %v1158_v44 }
 0x169   : > { %v951_v51 = vpop.f32.mrf.mxu0  ;;  %v1079_v52 = vpop.f32.mrf.mxu1 }
 0x16a   : > { %1581 = vst.msk [vmem:[%s2359_s29 + $0x6c] sm:$0xf] %vm1553_vm3, %v1947_v47  ;;  %1613 = vst.msk [vmem:[%s2359_s29 + $0xec] sm:$0xf] %vm1553_vm3, %v1979_v48  ;;  %v1261_v53 = vmax.f32 %v1197_v49, 0.0  ;;  %v1293_v54 = vmax.f32 %v1229_v50, 0.0  ;;  %v1127_v55 = vmul.f32 %v2342_v15, %v951_v51  ;;  %v1159_v56 = vmul.f32 %v2342_v15, %v1079_v52 }
 0x16b   : > { %v953_v57 = vpop.f32.mrf.mxu0  ;;  %v1081_v58 = vpop.f32.mrf.mxu1 }
 0x16c   : > { %v1948_v59 = vpack.c.bf16 %v1261_v53, %v1261_v53  ;;  %v1980_v60 = vpack.c.bf16 %v1293_v54, %v1293_v54  ;;  %v1198_v61 = vadd.f32 %v2347_v17, %v1127_v55  ;;  %v1230_v62 = vadd.f32 %v2347_v17, %v1159_v56 }
 0x16d   : > { %v956_v63 = vpop.f32.mrf.mxu0  ;;  %v1084_v0 = vpop.f32.mrf.mxu1 }
 0x16e   : > { %1582 = vst.msk [vmem:[%s2359_s29 + $0x70] sm:$0xf] %vm1553_vm3, %v1948_v59  ;;  %1614 = vst.msk [vmem:[%s2359_s29 + $0xf0] sm:$0xf] %vm1553_vm3, %v1980_v60  ;;  %v1262_v1 = vmax.f32 %v1198_v61, 0.0  ;;  %v1294_v2 = vmax.f32 %v1230_v62, 0.0  ;;  %v1128_v3 = vmul.f32 %v2342_v15, %v956_v63  ;;  %v1160_v4 = vmul.f32 %v2342_v15, %v1084_v0 }
 0x16f   : > { %v958_v5 = vpop.f32.mrf.mxu0  ;;  %v1086_v6 = vpop.f32.mrf.mxu1 }
 0x170   : > { %v1949_v7 = vpack.c.bf16 %v1262_v1, %v1262_v1  ;;  %v1981_v8 = vpack.c.bf16 %v1294_v2, %v1294_v2  ;;  %v1199_v9 = vadd.f32 %v2347_v17, %v1128_v3  ;;  %v1231_v10 = vadd.f32 %v2347_v17, %v1160_v4 }
 0x171   : > { %v959_v11 = vpop.f32.mrf.mxu0  ;;  %v1087_v12 = vpop.f32.mrf.mxu1 }
 0x172   : > { %1583 = vst.msk [vmem:[%s2359_s29 + $0x74] sm:$0xf] %vm1553_vm3, %v1949_v7  ;;  %1615 = vst.msk [vmem:[%s2359_s29 + $0xf4] sm:$0xf] %vm1553_vm3, %v1981_v8  ;;  %v1263_v13 = vmax.f32 %v1199_v9, 0.0  ;;  %v1295_v14 = vmax.f32 %v1231_v10, 0.0  ;;  %v1129_v16 = vmul.f32 %v2342_v15, %v959_v11  ;;  %v1161_v18 = vmul.f32 %v2342_v15, %v1087_v12 }
 0x173   : > { %v961_v19 = vpop.f32.mrf.mxu0  ;;  %v1089_v20 = vpop.f32.mrf.mxu1 }
 0x174   : > { %v1950_v21 = vpack.c.bf16 %v1263_v13, %v1263_v13  ;;  %v1982_v22 = vpack.c.bf16 %v1295_v14, %v1295_v14  ;;  %v1200_v23 = vadd.f32 %v2347_v17, %v1129_v16  ;;  %v1232_v24 = vadd.f32 %v2347_v17, %v1161_v18 }
 0x176   : > { %1584 = vst.msk [vmem:[%s2359_s29 + $0x78] sm:$0xf] %vm1553_vm3, %v1950_v21  ;;  %1616 = vst.msk [vmem:[%s2359_s29 + $0xf8] sm:$0xf] %vm1553_vm3, %v1982_v22  ;;  %v1264_v25 = vmax.f32 %v1200_v23, 0.0  ;;  %v1296_v26 = vmax.f32 %v1232_v24, 0.0 }
 0x178   : > { %v1951_v27 = vpack.c.bf16 %v1264_v25, %v1264_v25  ;;  %v1983_v28 = vpack.c.bf16 %v1296_v26, %v1296_v26 }
 0x17a   : > { %1585 = vst.msk [vmem:[%s2359_s29 + $0x7c] sm:$0xf] %vm1553_vm3, %v1951_v27  ;;  %1617 = vst.msk [vmem:[%s2359_s29 + $0xfc] sm:$0xf] %vm1553_vm3, %v1983_v28 }
 0x17b PF: > { %s14_s17 = sadd.s32 1, %s2158_s17   ;;  %s2625_s15 = smov %s2154_s16 }
 0x17c   : > { %p11_p5 = scmp.ge.s32.totalorder %s14_s17, 6   ;;  %s2626_s16 = smov %s2628_s18 }
 0x17e   :  { %13 = sbr.rel (!%p11_p5) target bundleno = 2 (0x2), region = 75 }

</bundles_post_ra>
